<compile_context>
chip_gen: v6e
topology: v6e:2x2x1
jax: 0.10.0
libtpu: 0.0.40
codegen_flags: <defaults>
</compile_context>

<pallas_src>
import functools

import jax
import jax.numpy as jnp
import numpy as np
from jax.experimental import pallas as pl
from jax.experimental.pallas import tpu as pltpu


def _round_up(v: int, m: int) -> int:
    return ((v + m - 1) // m) * m


def _club_kernel(x_ref, y_ref, stats_ref, w1_ref, w2_ref, w3_ref, b_ref, out_ref,
                 *, hidden, y_dim, ypad, tm, n_valid):
    """One row-tile of the CLUB forward; accumulates the batch sum into out_ref."""
    h2 = 2 * hidden
    yd = y_dim

    # ---- fused MLPs (p_mu | p_logvar): 3 bf16 MXU matmuls, f32 accumulate ----
    xb = x_ref[...]                                                   # (tm, x_dim) bf16
    h = jnp.dot(xb, w1_ref[...], preferred_element_type=jnp.float32)
    h = jnp.maximum(h + b_ref[:, 0:h2], 0.0)                          # (tm, 2H) f32
    h = jnp.dot(h.astype(jnp.bfloat16), w2_ref[...],
                preferred_element_type=jnp.float32)
    h = jnp.maximum(h + b_ref[:, h2:2 * h2], 0.0)                     # (tm, 2H) f32
    o = jnp.dot(h.astype(jnp.bfloat16), w3_ref[...],
                preferred_element_type=jnp.float32)
    o = o + b_ref[:, 2 * h2:2 * h2 + 2 * ypad]                        # (tm, 2*ypad) f32

    mu = o[:, 0:yd]                                                   # lanes [0, yd)
    logvar = jnp.tanh(o[:, ypad:ypad + yd])                           # lanes [ypad, ypad+yd)

    # ---- energies (global y statistics come precomputed from the wrapper) ----
    y = y_ref[...]                                                    # (tm, yd) f32
    y_mean = stats_ref[:, 0:yd]                                       # (1, yd)
    y2_mean = stats_ref[:, ypad:ypad + yd]                            # (1, yd)
    inv_var = jnp.exp(-logvar)
    # positive - negative == -0.5 * inv_var * (y*(y - 2*mu) + 2*mu*y_mean - y2_mean)
    combined = -0.5 * inv_var * (y * (y - 2.0 * mu) + 2.0 * mu * y_mean - y2_mean)

    # mask rows that are only batch padding (last tile may be ragged)
    row = pl.program_id(0) * tm + jax.lax.broadcasted_iota(jnp.int32, (tm, 1), 0)
    combined = jnp.where(row < n_valid, combined, 0.0)

    # ---- accumulate across the grid; finalize (mean over N) on the last step ----
    @pl.when(pl.program_id(0) == 0)
    def _():
        out_ref[...] = jnp.zeros_like(out_ref)

    out_ref[...] += jnp.sum(combined, keepdims=True)

    @pl.when(pl.program_id(0) == pl.num_programs(0) - 1)
    def _():
        out_ref[...] = out_ref[...] * (1.0 / n_valid)


def club_forward(x, y, params, *, tm=256):
    """CLUB MI upper bound.  x:(N, x_dim), y:(N, y_dim) float32 -> scalar f32."""
    n, x_dim = x.shape
    _, y_dim = y.shape
    (w1m, b1m, w2m, b2m, w3m, b3m, w1v, b1v, w2v, b2v, w3v, b3v) = params
    hidden = w1m.shape[1]
    h2 = 2 * hidden
    ypad = _round_up(y_dim, 128)          # lane-align the mu / logvar split

    # ---- pack 12 Linear params into 3 fused weights + 1 bias row -------------
    zhh = jnp.zeros((hidden, hidden), jnp.float32)
    w1 = jnp.concatenate([w1m, w1v], axis=1)                               # (x_dim, 2H)
    w2 = jnp.concatenate([jnp.concatenate([w2m, zhh], axis=1),
                          jnp.concatenate([zhh, w2v], axis=1)], axis=0)    # (2H, 2H)
    w3 = jnp.zeros((h2, 2 * ypad), jnp.float32)                            # (2H, 2*ypad)
    w3 = w3.at[:hidden, 0:y_dim].set(w3m)
    w3 = w3.at[hidden:, ypad:ypad + y_dim].set(w3v)
    bias = jnp.zeros((1, 2 * h2 + 2 * ypad), jnp.float32)
    bias = bias.at[:, 0:hidden].set(b1m).at[:, hidden:h2].set(b1v)
    bias = bias.at[:, h2:h2 + hidden].set(b2m).at[:, h2 + hidden:2 * h2].set(b2v)
    bias = bias.at[:, 2 * h2:2 * h2 + y_dim].set(b3m)
    bias = bias.at[:, 2 * h2 + ypad:2 * h2 + ypad + y_dim].set(b3v)
    # bf16 MXU operands; accumulation and elementwise math stay f32 in-kernel.
    w1, w2, w3 = (w.astype(jnp.bfloat16) for w in (w1, w2, w3))

    # ---- global y statistics (full batch; required once N is tiled) ----------
    stats = jnp.zeros((1, 2 * ypad), jnp.float32)
    stats = stats.at[:, 0:y_dim].set(jnp.mean(y, axis=0, keepdims=True))
    stats = stats.at[:, ypad:ypad + y_dim].set(jnp.mean(y * y, axis=0, keepdims=True))

    # ---- pad batch to a multiple of the row tile (bf16 x => multiple of 16) --
    tm = _round_up(max(16, min(tm, _round_up(n, 16))), 16)
    n_pad = _round_up(n, tm)
    xp = jnp.pad(x.astype(jnp.bfloat16), ((0, n_pad - n), (0, 0)))
    yp = jnp.pad(y, ((0, n_pad - n), (0, 0)))
    num_tiles = n_pad // tm

    kernel = functools.partial(_club_kernel, hidden=hidden, y_dim=y_dim,
                               ypad=ypad, tm=tm, n_valid=n)
    out = pl.pallas_call(
        kernel,
        out_shape=jax.ShapeDtypeStruct((1, 1), jnp.float32),
        grid=(num_tiles,),
        in_specs=[
            pl.BlockSpec((tm, x_dim), lambda i: (i, 0)),               # x tile (bf16)
            pl.BlockSpec((tm, y_dim), lambda i: (i, 0)),               # y tile (f32)
            pl.BlockSpec((1, 2 * ypad), lambda i: (0, 0)),             # y stats (resident)
            pl.BlockSpec((x_dim, h2), lambda i: (0, 0)),               # fused W1 (resident)
            pl.BlockSpec((h2, h2), lambda i: (0, 0)),                  # fused W2 (resident)
            pl.BlockSpec((h2, 2 * ypad), lambda i: (0, 0)),            # fused W3 (resident)
            pl.BlockSpec((1, 2 * h2 + 2 * ypad), lambda i: (0, 0)),    # fused biases
        ],
        out_specs=pl.BlockSpec((1, 1), lambda i: (0, 0)),              # scalar accumulator
        compiler_params=pltpu.CompilerParams(
            dimension_semantics=("arbitrary",),    # batch axis is a reduction here
            vmem_limit_bytes=32 * 1024 * 1024,
        ),
    )(xp, yp, stats, w1, w2, w3, bias)
    return out[0, 0]


def init_params(key, x_dim, y_dim, hidden):
    """PyTorch-style nn.Linear init; weights stored transposed: (in, out)."""
    def linear(k, fan_in, fan_out):
        kw, kb = jax.random.split(k)
        bound = 1.0 / np.sqrt(fan_in)
        w = jax.random.uniform(kw, (fan_in, fan_out), jnp.float32, -bound, bound)
        b = jax.random.uniform(kb, (1, fan_out), jnp.float32, -bound, bound)
        return w, b

    keys = jax.random.split(key, 6)
    w1m, b1m = linear(keys[0], x_dim, hidden)   # p_mu
    w2m, b2m = linear(keys[1], hidden, hidden)
    w3m, b3m = linear(keys[2], hidden, y_dim)
    w1v, b1v = linear(keys[3], x_dim, hidden)   # p_logvar
    w2v, b2v = linear(keys[4], hidden, hidden)
    w3v, b3v = linear(keys[5], hidden, y_dim)
    return (w1m, b1m, w2m, b2m, w3m, b3m, w1v, b1v, w2v, b2v, w3v, b3v)


def club_reference(x, y, params, matmul_dtype=jnp.float32):
    """Pure-JAX reference mirroring the PyTorch forward (optionally bf16 matmuls)."""
    (w1m, b1m, w2m, b2m, w3m, b3m, w1v, b1v, w2v, b2v, w3v, b3v) = params

    def lin(a, w, b):
        return jnp.dot(a.astype(matmul_dtype), w.astype(matmul_dtype),
                       preferred_element_type=jnp.float32) + b

    h = jax.nn.relu(lin(x, w1m, b1m))
    h = jax.nn.relu(lin(h, w2m, b2m))
    mu = lin(h, w3m, b3m)
    g = jax.nn.relu(lin(x, w1v, b1v))
    g = jax.nn.relu(lin(g, w2v, b2v))
    logvar = jnp.tanh(lin(g, w3v, b3v))

    positive = -0.5 * (mu - y) ** 2 / jnp.exp(logvar)
    pred = mu[:, None, :]                        # (N, 1, D)
    yb = y[None, :, :]                           # (1, N, D)
    negative = -0.5 * ((pred - yb) ** 2).mean(axis=1) / jnp.exp(logvar)
    return (positive.sum(-1) - negative.sum(-1)).mean()


if __name__ == "__main__":
    N, X_DIM, Y_DIM, HIDDEN = 100, 16, 8, 64     # HIDDEN matches the nn.Module default

    key = jax.random.PRNGKey(0)
    kx, ky, kp = jax.random.split(key, 3)
    x = jax.random.normal(kx, (N, X_DIM), jnp.float32)
    y = jax.random.normal(ky, (N, Y_DIM), jnp.float32)
    params = init_params(kp, X_DIM, Y_DIM, HIDDEN)

    # tm=64 -> 2 grid steps at this toy batch (exercises accumulation + row masking)
    club = jax.jit(functools.partial(club_forward, tm=64))
    out = jax.block_until_ready(club(x, y, params))

    # tight check vs. a JAX reference using the same bf16 matmul rounding as the kernel
    ref_mixed = jax.block_until_ready(club_reference(x, y, params, jnp.bfloat16))
    np.testing.assert_allclose(np.asarray(out), np.asarray(ref_mixed),
                               rtol=1e-2, atol=5e-3)
    # fidelity check vs. the full-f32 PyTorch-semantics reference (bf16 MXU tolerance)
    ref_f32 = jax.block_until_ready(club_reference(x, y, params, jnp.float32))
    np.testing.assert_allclose(np.asarray(out), np.asarray(ref_f32),
                               rtol=5e-2, atol=5e-2)

    print("KERNEL_OK")
</pallas_src>

<mosaic_0001>
module attributes {stable_mosaic.version = 11 : i64} {
  func.func @_club_kernel(%arg0: i32, %arg1: memref<64x16xbf16, #tpu.memory_space<vmem>>, %arg2: memref<64x8xf32, #tpu.memory_space<vmem>>, %arg3: memref<1x256xf32, #tpu.memory_space<vmem>>, %arg4: memref<16x128xbf16, #tpu.memory_space<vmem>>, %arg5: memref<128x128xbf16, #tpu.memory_space<vmem>>, %arg6: memref<128x256xbf16, #tpu.memory_space<vmem>>, %arg7: memref<1x512xf32, #tpu.memory_space<vmem>>, %arg8: memref<1x1xf32, #tpu.memory_space<vmem>>) attributes {dimension_semantics = [#tpu.dimension_semantics<arbitrary>], iteration_bounds = array<i64: 2>, scalar_prefetch = 0 : i64, scratch_operands = 0 : i64, tpu.core_type = #tpu.core_type<tc>, window_params = [{transform_indices = @transform_0, window_bounds = array<i64: 64, 16>}, {transform_indices = @transform_1, window_bounds = array<i64: 64, 8>}, {pipeline_mode = #tpu.pipeline_mode<synchronous>, transform_indices = @transform_2, window_bounds = array<i64: 1, 256>}, {pipeline_mode = #tpu.pipeline_mode<synchronous>, transform_indices = @transform_3, window_bounds = array<i64: 16, 128>}, {pipeline_mode = #tpu.pipeline_mode<synchronous>, transform_indices = @transform_4, window_bounds = array<i64: 128, 128>}, {pipeline_mode = #tpu.pipeline_mode<synchronous>, transform_indices = @transform_5, window_bounds = array<i64: 128, 256>}, {pipeline_mode = #tpu.pipeline_mode<synchronous>, transform_indices = @transform_6, window_bounds = array<i64: 1, 512>}, {pipeline_mode = #tpu.pipeline_mode<synchronous>, transform_indices = @transform_7, window_bounds = array<i64: 1, 1>}]} {
    %c0 = arith.constant 0 : index
    %c0_0 = arith.constant 0 : index
    %0 = vector.load %arg1[%c0, %c0_0] : memref<64x16xbf16, #tpu.memory_space<vmem>>, vector<64x16xbf16>
    %c0_1 = arith.constant 0 : index
    %c0_2 = arith.constant 0 : index
    %1 = vector.load %arg4[%c0_1, %c0_2] : memref<16x128xbf16, #tpu.memory_space<vmem>>, vector<16x128xbf16>
    %cst = arith.constant dense<0.000000e+00> : vector<64x128xf32>
    %2 = tpu.matmul %0, %1, %cst {dimension_numbers = #tpu.dot_dimension_numbers<[1], [0], [0], [1], [0, 0, 1, 1], [], []>} : vector<64x16xbf16>, vector<16x128xbf16>, vector<64x128xf32> -> vector<64x128xf32>
    %c0_3 = arith.constant 0 : index
    %c0_4 = arith.constant 0 : index
    %3 = vector.load %arg7[%c0_3, %c0_4] : memref<1x512xf32, #tpu.memory_space<vmem>>, vector<1x128xf32>
    %4 = vector.broadcast %3 : vector<1x128xf32> to vector<64x128xf32>
    %5 = arith.addf %2, %4 : vector<64x128xf32>
    %cst_5 = arith.constant 0.000000e+00 : f32
    %6 = vector.broadcast %cst_5 : f32 to vector<64x128xf32>
    %7 = arith.maximumf %5, %6 : vector<64x128xf32>
    %8 = arith.truncf %7 : vector<64x128xf32> to vector<64x128xbf16>
    %c0_6 = arith.constant 0 : index
    %c0_7 = arith.constant 0 : index
    %9 = vector.load %arg5[%c0_6, %c0_7] : memref<128x128xbf16, #tpu.memory_space<vmem>>, vector<128x128xbf16>
    %cst_8 = arith.constant dense<0.000000e+00> : vector<64x128xf32>
    %10 = tpu.matmul %8, %9, %cst_8 {dimension_numbers = #tpu.dot_dimension_numbers<[1], [0], [0], [1], [0, 0, 1, 1], [], []>} : vector<64x128xbf16>, vector<128x128xbf16>, vector<64x128xf32> -> vector<64x128xf32>
    %c0_9 = arith.constant 0 : index
    %c128 = arith.constant 128 : index
    %11 = vector.load %arg7[%c0_9, %c128] : memref<1x512xf32, #tpu.memory_space<vmem>>, vector<1x128xf32>
    %12 = vector.broadcast %11 : vector<1x128xf32> to vector<64x128xf32>
    %13 = arith.addf %10, %12 : vector<64x128xf32>
    %cst_10 = arith.constant 0.000000e+00 : f32
    %14 = vector.broadcast %cst_10 : f32 to vector<64x128xf32>
    %15 = arith.maximumf %13, %14 : vector<64x128xf32>
    %16 = arith.truncf %15 : vector<64x128xf32> to vector<64x128xbf16>
    %c0_11 = arith.constant 0 : index
    %c0_12 = arith.constant 0 : index
    %17 = vector.load %arg6[%c0_11, %c0_12] : memref<128x256xbf16, #tpu.memory_space<vmem>>, vector<128x256xbf16>
    %cst_13 = arith.constant dense<0.000000e+00> : vector<64x256xf32>
    %18 = tpu.matmul %16, %17, %cst_13 {dimension_numbers = #tpu.dot_dimension_numbers<[1], [0], [0], [1], [0, 0, 1, 1], [], []>} : vector<64x128xbf16>, vector<128x256xbf16>, vector<64x256xf32> -> vector<64x256xf32>
    %c0_14 = arith.constant 0 : index
    %c256 = arith.constant 256 : index
    %19 = vector.load %arg7[%c0_14, %c256] : memref<1x512xf32, #tpu.memory_space<vmem>>, vector<1x256xf32>
    %20 = vector.broadcast %19 : vector<1x256xf32> to vector<64x256xf32>
    %21 = arith.addf %18, %20 : vector<64x256xf32>
    %22 = vector.extract_strided_slice %21 {offsets = [0, 0], sizes = [64, 8], strides = [1, 1]} : vector<64x256xf32> to vector<64x8xf32>
    %23 = vector.extract_strided_slice %21 {offsets = [0, 128], sizes = [64, 8], strides = [1, 1]} : vector<64x256xf32> to vector<64x8xf32>
    %24 = math.tanh %23 : vector<64x8xf32>
    %c0_15 = arith.constant 0 : index
    %c0_16 = arith.constant 0 : index
    %25 = vector.load %arg2[%c0_15, %c0_16] : memref<64x8xf32, #tpu.memory_space<vmem>>, vector<64x8xf32>
    %c0_17 = arith.constant 0 : index
    %c0_18 = arith.constant 0 : index
    %26 = vector.load %arg3[%c0_17, %c0_18] : memref<1x256xf32, #tpu.memory_space<vmem>>, vector<1x8xf32>
    %c0_19 = arith.constant 0 : index
    %c128_20 = arith.constant 128 : index
    %27 = vector.load %arg3[%c0_19, %c128_20] : memref<1x256xf32, #tpu.memory_space<vmem>>, vector<1x8xf32>
    %cst_21 = arith.constant 0.000000e+00 : f32
    %28 = vector.broadcast %cst_21 : f32 to vector<64x8xf32>
    %29 = arith.subf %28, %24 : vector<64x8xf32>
    %30 = math.exp %29 : vector<64x8xf32>
    %cst_22 = arith.constant -5.000000e-01 : f32
    %31 = vector.broadcast %cst_22 : f32 to vector<64x8xf32>
    %32 = arith.mulf %31, %30 : vector<64x8xf32>
    %cst_23 = arith.constant 2.000000e+00 : f32
    %33 = vector.broadcast %cst_23 : f32 to vector<64x8xf32>
    %34 = arith.mulf %33, %22 : vector<64x8xf32>
    %35 = arith.subf %25, %34 : vector<64x8xf32>
    %36 = arith.mulf %25, %35 : vector<64x8xf32>
    %cst_24 = arith.constant 2.000000e+00 : f32
    %37 = vector.broadcast %cst_24 : f32 to vector<64x8xf32>
    %38 = arith.mulf %37, %22 : vector<64x8xf32>
    %39 = vector.broadcast %26 : vector<1x8xf32> to vector<64x8xf32>
    %40 = arith.mulf %38, %39 : vector<64x8xf32>
    %41 = arith.addf %36, %40 : vector<64x8xf32>
    %42 = vector.broadcast %27 : vector<1x8xf32> to vector<64x8xf32>
    %43 = arith.subf %41, %42 : vector<64x8xf32>
    %44 = arith.mulf %32, %43 : vector<64x8xf32>
    %c64_i32 = arith.constant 64 : i32
    %45 = arith.muli %arg0, %c64_i32 : i32
    %46 = tpu.iota {dimensions = array<i32: 0>} : vector<64x1xi32>
    %47 = vector.broadcast %45 : i32 to vector<64x1xi32>
    %48 = arith.addi %47, %46 : vector<64x1xi32>
    %c100_i32 = arith.constant 100 : i32
    %49 = vector.broadcast %c100_i32 : i32 to vector<64x1xi32>
    %50 = arith.cmpi slt, %48, %49 : vector<64x1xi32>
    %cst_25 = arith.constant 0.000000e+00 : f32
    %51 = vector.shape_cast %50 : vector<64x1xi1> to vector<64x1xi1>
    %52 = vector.broadcast %51 : vector<64x1xi1> to vector<64x8xi1>
    %53 = vector.broadcast %cst_25 : f32 to vector<64x8xf32>
    %54 = arith.select %52, %44, %53 : vector<64x8xi1>, vector<64x8xf32>
    %c0_i32 = arith.constant 0 : i32
    %55 = arith.cmpi eq, %arg0, %c0_i32 : i32
    %56 = arith.extui %55 : i1 to i32
    %c0_i32_26 = arith.constant 0 : i32
    %57 = arith.cmpi ne, %56, %c0_i32_26 : i32
    scf.if %57 {
      %cst_33 = arith.constant 0.000000e+00 : f32
      %69 = vector.broadcast %cst_33 : f32 to vector<1x1xf32>
      %c0_34 = arith.constant 0 : index
      %c0_35 = arith.constant 0 : index
      %70 = vector.load %arg8[%c0_34, %c0_35] : memref<1x1xf32, #tpu.memory_space<vmem>>, vector<1x1xf32>
      tpu.vector_store %arg8[%c0_34, %c0_35], %69 {strides = array<i32>} : memref<1x1xf32, #tpu.memory_space<vmem>>, vector<1x1xf32>,
    } else {
    }
    %c0_27 = arith.constant 0 : index
    %c0_28 = arith.constant 0 : index
    %58 = vector.load %arg8[%c0_27, %c0_28] : memref<1x1xf32, #tpu.memory_space<vmem>>, vector<1x1xf32>
    %59 = vector.shape_cast %54 : vector<64x8xf32> to vector<1x64x8xf32>
    %cst_29 = arith.constant dense<0.000000e+00> : vector<1xf32>
    %60 = vector.multi_reduction <add>, %59, %cst_29 [1, 2] : vector<1x64x8xf32> to vector<1xf32>
    %61 = vector.shape_cast %60 : vector<1xf32> to vector<1x1x1xf32>
    %62 = vector.extract %61[0, 0, 0] : f32 from vector<1x1x1xf32>
    %63 = vector.broadcast %62 : f32 to vector<1x1xf32>
    %64 = arith.addf %58, %63 : vector<1x1xf32>
    %c0_30 = arith.constant 0 : index
    %c0_31 = arith.constant 0 : index
    %65 = vector.load %arg8[%c0_30, %c0_31] : memref<1x1xf32, #tpu.memory_space<vmem>>, vector<1x1xf32>
    tpu.vector_store %arg8[%c0_30, %c0_31], %64 {strides = array<i32>} : memref<1x1xf32, #tpu.memory_space<vmem>>, vector<1x1xf32>,
    %c1_i32 = arith.constant 1 : i32
    %66 = arith.cmpi eq, %arg0, %c1_i32 : i32
    %67 = arith.extui %66 : i1 to i32
    %c0_i32_32 = arith.constant 0 : i32
    %68 = arith.cmpi ne, %67, %c0_i32_32 : i32
    scf.if %68 {
      %c0_33 = arith.constant 0 : index
      %c0_34 = arith.constant 0 : index
      %69 = vector.load %arg8[%c0_33, %c0_34] : memref<1x1xf32, #tpu.memory_space<vmem>>, vector<1x1xf32>
      %cst_35 = arith.constant 0.00999999977 : f32
      %70 = vector.broadcast %cst_35 : f32 to vector<1x1xf32>
      %71 = arith.mulf %69, %70 : vector<1x1xf32>
      %c0_36 = arith.constant 0 : index
      %c0_37 = arith.constant 0 : index
      %72 = vector.load %arg8[%c0_36, %c0_37] : memref<1x1xf32, #tpu.memory_space<vmem>>, vector<1x1xf32>
      tpu.vector_store %arg8[%c0_36, %c0_37], %71 {strides = array<i32>} : memref<1x1xf32, #tpu.memory_space<vmem>>, vector<1x1xf32>,
    } else {
    }
    return
  }
  func.func @transform_0(%arg0: i32) -> (i32, i32) {
    %c0_i32 = arith.constant 0 : i32
    %c0_i32_0 = arith.constant 0 : i32
    return %arg0, %c0_i32 : i32, i32
  }
  func.func @transform_1(%arg0: i32) -> (i32, i32) {
    %c0_i32 = arith.constant 0 : i32
    %c0_i32_0 = arith.constant 0 : i32
    return %arg0, %c0_i32 : i32, i32
  }
  func.func @transform_2(%arg0: i32) -> (i32, i32) {
    %c0_i32 = arith.constant 0 : i32
    %c0_i32_0 = arith.constant 0 : i32
    %c0_i32_1 = arith.constant 0 : i32
    return %c0_i32, %c0_i32_0 : i32, i32
  }
  func.func @transform_3(%arg0: i32) -> (i32, i32) {
    %c0_i32 = arith.constant 0 : i32
    %c0_i32_0 = arith.constant 0 : i32
    %c0_i32_1 = arith.constant 0 : i32
    return %c0_i32, %c0_i32_0 : i32, i32
  }
  func.func @transform_4(%arg0: i32) -> (i32, i32) {
    %c0_i32 = arith.constant 0 : i32
    %c0_i32_0 = arith.constant 0 : i32
    %c0_i32_1 = arith.constant 0 : i32
    return %c0_i32, %c0_i32_0 : i32, i32
  }
  func.func @transform_5(%arg0: i32) -> (i32, i32) {
    %c0_i32 = arith.constant 0 : i32
    %c0_i32_0 = arith.constant 0 : i32
    %c0_i32_1 = arith.constant 0 : i32
    return %c0_i32, %c0_i32_0 : i32, i32
  }
  func.func @transform_6(%arg0: i32) -> (i32, i32) {
    %c0_i32 = arith.constant 0 : i32
    %c0_i32_0 = arith.constant 0 : i32
    %c0_i32_1 = arith.constant 0 : i32
    return %c0_i32, %c0_i32_0 : i32, i32
  }
  func.func @transform_7(%arg0: i32) -> (i32, i32) {
    %c0_i32 = arith.constant 0 : i32
    %c0_i32_0 = arith.constant 0 : i32
    %c0_i32_1 = arith.constant 0 : i32
    return %c0_i32, %c0_i32_0 : i32, i32
  }
}

</mosaic_0001>

<bundles_post_ra>
// kernel: club_forward.1
= control target key start
LH: loop header
LB: loop body
LE: loop exit
PB: predicated region body
PF: predicated region fallthrough
CT: control target
= control target key end

     0   :  { %12 = vsyncpa [#allocation3], 0  ;;  %s1292_s24 = smov 0   ;;  %s1508_s0 = inlined_call_operand.vmem [shape: bf16[128,16], index: 0, kind: input, shape index: {}]   ;;  %s1509_s1 = inlined_call_operand.vmem [shape: f32[128,8], index: 1, kind: input, shape index: {}]   ;;  %s1510_s2 = inlined_call_operand.vmem [shape: f32[1,256], index: 2, kind: input, shape index: {}]   ;;  %s1511_s3 = inlined_call_operand.vmem [shape: bf16[16,128], index: 3, kind: input, shape index: {}]   ;;  %s1512_s4 = inlined_call_operand.vmem [shape: bf16[128,128], index: 4, kind: input, shape index: {}]   ;;  %s1513_s5 = inlined_call_operand.vmem [shape: bf16[128,256], index: 5, kind: input, shape index: {}]   ;;  %s1514_s6 = inlined_call_operand.vmem [shape: f32[1,512], index: 6, kind: input, shape index: {}]   ;;  %s1515_s7 = inlined_call_operand.hbm [shape: f32[1,1], index: 7, kind: output, shape index: {}]  }
   0x1 LB: > { %s1298_s25 = sadd.s32 4294967295, %s1247_s24   ;;  %p1025_p0 = scmp.ge.s32.totalorder %s1247_s24, 1  ;;  %s1247_s24 = sphi %s1292_s24, %s18_s24  }
   0x2   : > { %p245_p1 = scmp.lt.s32.totalorder %s1247_s24, 3 }
   0x4   : > { %p246_p2 = pnand %p1025_p0, %p245_p1 }
   0x5   : > { %s1026_s28 = sshll.u32 (!%p246_p2), %s1298_s25, 3  ;;  %p1068_p4 = scmp.ne.s32.totalorder (!%p246_p2), %s1298_s25, 0 }
   0x6   : > { %249 = sbr.rel (%p246_p2) target bundleno = 936 (0x3a8), region = 48  ;;  %p278_p3 = scmp.lt.s32.totalorder (!%p246_p2), %s1026_s28, 15 }
   0xb   : > { %v1144_v0 = vld [vmem:[%s1511_s3] sm:$0xff]   ;;  %v1149_v1 = vld [vmem:[%s1512_s4 + $0x38] sm:$0xff]   ;;  %s1517_s28 = smov (!%p278_p3, %s1026_s28), 15  ;;  %vm333_vm0 = vcmask 130048   ;;  %v1150_v2 = vld [vmem:[%s1512_s4 + $0x30] sm:$0xff]   ;;  %v1249_v58 = vmov 0  }
   0xc   : > { %1091 = vmatprep.subr.bf16.mxu1 %v1144_v0  ;;  %s1027_s8 = sshll.u32 %s1517_s28, 2  ;;  %v1151_v6 = vld [vmem:[%s1512_s4 + $0x28] sm:$0xff]   ;;  %v1152_v8 = vld [vmem:[%s1512_s4 + $0x20] sm:$0xff]   ;;  %v1153_v9 = vld [vmem:[%s1512_s4 + $0x18] sm:$0xff]   ;;  %711 = vmatprep.mubr.bf16.mxu0 %v1249_v58  ;;  %s1029_s26 = sshll.u32 %s1517_s28, 3 }
   0xd   : > { %1092 = vmatpush3.bf16.msra.mxu1 %v1144_v0  ;;  %s281_s11 = scalar_lea.vmem %s1508_s0, %s1027_s8  ;;  %v1154_v10 = vld [vmem:[%s1512_s4 + $0x10] sm:$0xff]   ;;  %v1155_v11 = vld [vmem:[%s1512_s4 + $0x8] sm:$0xff]   ;;  %v1156_v12 = vld [vmem:[%s1512_s4] sm:$0xff]   ;;  %s1410_s30 = scalar_lea.vmem %s1509_s1, %s1029_s26 }
   0xe   : > { %1101 = vmatprep.subr.bf16.mxu1 %v1149_v1  ;;  %v1145_v3 = vld [vmem:[%s281_s11] sm:$0xff]   ;;  %v1146_v4 = vld [vmem:[%s281_s11 + $0x8] sm:$0xff]   ;;  %v1147_v5 = vld [vmem:[%s281_s11 + $0x10] sm:$0xff]   ;;  %s1067_s28 = sshll.u32 %s1298_s25, 6 }
   0xf   : > { %1093 = vmatprep.mubr.msk.bf16.mxu1 %vm333_vm0, %v1145_v3  ;;  %v1148_v7 = vld [vmem:[%s281_s11 + $0x18] sm:$0xff]   ;;  %v1160_v15 = vld [vmem:[%s1513_s5 + $0x64] ss:$8 sps:$4 sm:$0xff]   ;;  %v1162_v16 = vld [vmem:[%s1513_s5 + $0x60] ss:$8 sps:$4 sm:$0xff]  }
  0x10   : > { %1094 = vmatmul.mubr.msk.bf16.vlgmr.msra.gmra.mxu1 %vm333_vm0, %v1146_v4  ;;  %v1157_v13 = vld [vmem:[%s1513_s5 + $0x74] ss:$8 sps:$4 sm:$0xff]   ;;  %v1159_v14 = vld [vmem:[%s1513_s5 + $0x70] ss:$8 sps:$4 sm:$0xff]   ;;  %v1166_v19 = vld [vmem:[%s1513_s5 + $0x44] ss:$8 sps:$4 sm:$0xff]  }
  0x11   : > { %1097 = vmatprep.mubr.msk.bf16.mxu1 %vm333_vm0, %v1147_v5  ;;  %1102 = vmatpush3.bf16.msra.mxu1 %v1149_v1  ;;  %v1163_v17 = vld [vmem:[%s1513_s5 + $0x54] ss:$8 sps:$4 sm:$0xff]   ;;  %v1165_v18 = vld [vmem:[%s1513_s5 + $0x50] ss:$8 sps:$4 sm:$0xff]   ;;  %v1168_v20 = vld [vmem:[%s1513_s5 + $0x40] ss:$8 sps:$4 sm:$0xff]  }
  0x12   : > { %1103 = vmatprep.subr.bf16.mxu1 %v1150_v2  ;;  %679 = vmatprep.subr.bf16.mxu0 %v1157_v13  ;;  %v1169_v21 = vld [vmem:[%s1513_s5 + $0x34] ss:$8 sps:$4 sm:$0xff]   ;;  %v1171_v22 = vld [vmem:[%s1513_s5 + $0x30] ss:$8 sps:$4 sm:$0xff]   ;;  %v1030_v25 = vld [vmem:[%s1514_s6] ss:$0 sm:$0xff] }
  0x13   : > { %680 = vmatpush1.bf16.msra.mxu0 %v1159_v14  ;;  %v1172_v52 = vld [vmem:[%s1513_s5 + $0x24] ss:$8 sps:$4 sm:$0xff]   ;;  %v1174_v53 = vld [vmem:[%s1513_s5 + $0x20] ss:$8 sps:$4 sm:$0xff]   ;;  %v1175_v54 = vld [vmem:[%s1513_s5 + $0x14] ss:$8 sps:$4 sm:$0xff]  }
  0x14   : > { %681 = vmatprep.subr.bf16.mxu0 %v1160_v15  ;;  %v1177_v55 = vld [vmem:[%s1513_s5 + $0x10] ss:$8 sps:$4 sm:$0xff]   ;;  %v1178_v56 = vld [vmem:[%s1513_s5 + $0x4] ss:$8 sps:$4 sm:$0xff]   ;;  %v1180_v57 = vld [vmem:[%s1513_s5] ss:$8 sps:$4 sm:$0xff]  }
  0x15   : > { %1104 = vmatpush3.bf16.msra.mxu1 %v1150_v2  ;;  %v1040_v61 = vld [vmem:[%s1514_s6 + $0x1] ss:$0 sm:$0xff] }
  0x16   : > { %1105 = vmatprep.subr.bf16.mxu1 %v1151_v6 }
  0x17   : > { %682 = vmatpush1.bf16.msra.mxu0 %v1162_v16 }
  0x18   : > { %1098 = vmatmul.mubr.msk.bf16.gmra.mxu1 %vm333_vm0, %v1148_v7  ;;  %683 = vmatprep.subr.bf16.mxu0 %v1163_v17 }
  0x19   : > { %1106 = vmatpush3.bf16.msra.mxu1 %v1151_v6 }
  0x1a   : > { %1107 = vmatprep.subr.bf16.mxu1 %v1152_v8 }
  0x1b   : > { %684 = vmatpush1.bf16.msra.mxu0 %v1165_v18 }
  0x1c   : > { %685 = vmatprep.subr.bf16.mxu0 %v1166_v19 }
  0x1d   : > { %1108 = vmatpush3.bf16.msra.mxu1 %v1152_v8 }
  0x1e   : > { %1109 = vmatprep.subr.bf16.mxu1 %v1153_v9 }
  0x1f   : > { %686 = vmatpush1.bf16.msra.mxu0 %v1168_v20 }
  0x20   : > { %687 = vmatprep.subr.bf16.mxu0 %v1169_v21 }
  0x21   : > { %1110 = vmatpush3.bf16.msra.mxu1 %v1153_v9 }
  0x22   : > { %1111 = vmatprep.subr.bf16.mxu1 %v1154_v10 }
  0x23   : > { %688 = vmatpush1.bf16.msra.mxu0 %v1171_v22 }
  0x24   : > { %689 = vmatprep.subr.bf16.mxu0 %v1172_v52 }
  0x25   : > { %1112 = vmatpush3.bf16.msra.mxu1 %v1154_v10 }
  0x26   : > { %1113 = vmatprep.subr.bf16.mxu1 %v1155_v11 }
  0x27   : > { %690 = vmatpush1.bf16.msra.mxu0 %v1174_v53 }
  0x28   : > { %691 = vmatprep.subr.bf16.mxu0 %v1175_v54  ;;  %v760_v54 = vld [vmem:[%s1410_s30] sm:$0xff] }
  0x29   : > { %1114 = vmatpush3.bf16.msra.mxu1 %v1155_v11 }
  0x2a   : > { %1115 = vmatprep.subr.bf16.mxu1 %v1156_v12 }
  0x2b   : > { %692 = vmatpush1.bf16.msra.mxu0 %v1177_v55 }
  0x2c   : > { %693 = vmatprep.subr.bf16.mxu0 %v1178_v56 }
  0x2d   : > { %1116 = vmatpush3.bf16.msra.mxu1 %v1156_v12 }
  0x2f   : > { %694 = vmatpush1.bf16.msra.mxu0 %v1180_v57 }
  0xd0   : > { %v1095_v23 = vpop.f32.mrf.mxu1 }
  0xd1   : > { %v389_v29 = vadd.f32 %v1095_v23, %v1030_v25 }
  0xd2   : > { %v380_v24 = vpop.f32.mrf.mxu1 }
  0xd3   : > { %v381_v27 = vadd.f32 %v1030_v25, %v380_v24  ;;  %v413_v36 = vmax.f32 %v389_v29, 0.0  ;;  %v589_v24 = vlaneseq }
  0xd4   : > { %v1096_v26 = vpop.f32.mrf.mxu1 }
  0xd5   : > { %v392_v28 = vadd.f32 %v1096_v26, %v1030_v25  ;;  %v411_v34 = vmax.f32 %v381_v27, 0.0  ;;  %v587_v27 = vld [vmem:[%s1514_s6 + $0x2] sm:$0x3] }
  0xd6   : > { %v383_v30 = vpop.f32.mrf.mxu1 }
  0xd7   : > { %v384_v31 = vadd.f32 %v1030_v25, %v383_v30  ;;  %v414_v32 = vmax.f32 %v392_v28, 0.0 }
  0xd8   : > { %v1099_v33 = vpop.f32.mrf.mxu1 }
  0xd9   : > { %v412_v35 = vmax.f32 %v384_v31, 0.0  ;;  %v405_v37 = vadd.f32 %v1099_v33, %v1030_v25  ;;  %v420_v41 = vpack.c.bf16 %v414_v32, %v413_v36 }
  0xda   : > { %v396_v38 = vpop.f32.mrf.mxu1 }
  0xdb   : > { %v419_v39 = vpack.c.bf16 %v412_v35, %v411_v34  ;;  %v397_v40 = vadd.f32 %v1030_v25, %v396_v38  ;;  %v417_v44 = vmax.f32 %v405_v37, 0.0 }
  0xdc   : > { %v1100_v42 = vpop.f32.mrf.mxu1 }
  0xdd   : > { %v408_v43 = vadd.f32 %v1100_v42, %v1030_v25  ;;  %1117 = vmatprep.mubr.bf16.mxu1 %v419_v39  ;;  %v415_v46 = vmax.f32 %v397_v40, 0.0 }
  0xde   : > { %v399_v45 = vpop.f32.mrf.mxu1  ;;  %1118 = vmatmul.mubr.bf16.vlgmr.msra.gmra.mxu1 %v420_v41 }
  0xdf   : > { %v418_v47 = vmax.f32 %v408_v43, 0.0  ;;  %v400_v48 = vadd.f32 %v1030_v25, %v399_v45  ;;  %v1390_v25 = vshrl.u32 %v589_v24, 7  ;;  %v1440_v24 = vld [vmem:[%s1510_s2 + $0x1] ss:$0 sm:$0xff] }
  0xe1   : > { %v416_v49 = vmax.f32 %v400_v48, 0.0  ;;  %v422_v50 = vpack.c.bf16 %v418_v47, %v417_v44  ;;  %v595_v26 = vsub.s32 1, %v1390_v25  ;;  %v591_v36 = vsub.s32 0, %v1390_v25 }
  0xe3   : > { %v421_v51 = vpack.c.bf16 %v416_v49, %v415_v46  ;;  %v1396_v28 = vrot.slane %v587_v27, %v595_v26  ;;  %v1402_v40 = vrot.slane %v587_v27, %v591_v36  ;;  %v873_v27 = vadd.s32 8, %v1390_v25 }
  0xe5   : > { %1121 = vmatprep.mubr.bf16.mxu1 %v421_v51 }
  0xe6   : > { %1122 = vmatmul.mubr.bf16.gmra.mxu1 %v422_v50 }
 0x19e   : > { %v1119_v59 = vpop.f32.mrf.mxu1 }
 0x19f   : > { %v537_v9 = vadd.f32 %v1119_v59, %v1040_v61 }
 0x1a0   : > { %v528_v60 = vpop.f32.mrf.mxu1 }
 0x1a1   : > { %v529_v63 = vadd.f32 %v1040_v61, %v528_v60  ;;  %v561_v12 = vmax.f32 %v537_v9, 0.0  ;;  %v1429_v9 = vstv %s1067_s28 }
 0x1a2   : > { %v1120_v62 = vpop.f32.mrf.mxu1 }
 0x1a3   : > { %v559_v3 = vmax.f32 %v529_v63, 0.0  ;;  %v540_v6 = vadd.f32 %v1120_v62, %v1040_v61  ;;  %v761_v62 = vld [vmem:[%s1410_s30 + $0x8] sm:$0xff] }
 0x1a4   : > { %v531_v0 = vpop.f32.mrf.mxu1 }
 0x1a5   : > { %v532_v1 = vadd.f32 %v1040_v61, %v531_v0  ;;  %v562_v10 = vmax.f32 %v540_v6, 0.0 }
 0x1a6   : > { %v1123_v2 = vpop.f32.mrf.mxu1 }
 0x1a7   : > { %v560_v4 = vmax.f32 %v532_v1, 0.0  ;;  %v568_v13 = vpack.c.bf16 %v562_v10, %v561_v12  ;;  %v553_v20 = vadd.f32 %v1123_v2, %v1040_v61  ;;  %v762_v10 = vld [vmem:[%s1410_s30 + $0x10] sm:$0xff] }
 0x1a8   : > { %v544_v5 = vpop.f32.mrf.mxu1 }
 0x1a9   : > { %v567_v7 = vpack.c.bf16 %v560_v4, %v559_v3  ;;  %v545_v15 = vadd.f32 %v1040_v61, %v544_v5  ;;  %v565_v22 = vmax.f32 %v553_v20, 0.0  ;;  %v1424_v3 = vld [vmem:[%s1510_s2] ss:$0 sm:$0xff] }
 0x1aa   : > { %v1124_v8 = vpop.f32.mrf.mxu1 }
 0x1ab   : > { %712 = vmatmul.mubr.bf16.vlgmr.msra.gmra.mxu0 %v567_v7  ;;  %v563_v17 = vmax.f32 %v545_v15, 0.0  ;;  %v556_v18 = vadd.f32 %v1124_v8, %v1040_v61 }
 0x1ac   : > { %721 = vmatprep.mubr.bf16.mxu0 %v1249_v58  ;;  %v547_v11 = vpop.f32.mrf.mxu1 }
 0x1ad   : > { %v548_v14 = vadd.f32 %v1040_v61, %v547_v11  ;;  %v566_v21 = vmax.f32 %v556_v18, 0.0 }
 0x1af   : > { %v564_v16 = vmax.f32 %v548_v14, 0.0  ;;  %v570_v23 = vpack.c.bf16 %v566_v21, %v565_v22 }
 0x1b1   : > { %v569_v19 = vpack.c.bf16 %v564_v16, %v563_v17  ;;  %v881_v17 = vadd.s32 %v1429_v9, %v1390_v25 }
 0x1b3   : > { %722 = vmatmul.mubr.bf16.gmra.mxu0 %v568_v13  ;;  %vm889_vm1 = vcmp.lt.s32.totalorder %v881_v17, 100 }
 0x1b4   : > { %731 = vmatprep.mubr.bf16.mxu0 %v1249_v58 }
 0x1bb   : > { %732 = vmatmul.mubr.bf16.gmra.mxu0 %v569_v19 }
 0x1bc   : > { %741 = vmatprep.mubr.bf16.mxu0 %v1249_v58 }
 0x1c3   : > { %742 = vmatmul.mubr.bf16.gmra.mxu0 %v570_v23 }
 0x26b   : > { %v713_v29 = vpop.f32.mrf.mxu0 }
 0x26c   : > { %v714_v44 = vadd.f32 %v713_v29, %v1402_v40  ;;  %v763_v29 = vld [vmem:[%s1410_s30 + $0x18] sm:$0xff] }
 0x26d   : > { %v715_v30 = vpop.f32.mrf.mxu0 }
 0x26e   : > { %v716_v31 = vadd.f32 %v715_v30, %v1396_v28  ;;  %v802_v51 = vmul.f32 2.0, %v714_v44 }
 0x26f   : > { %v717_v32 = vpop.f32.mrf.mxu0 }
 0x270   : > { %1181 = vtanh.f32 %v716_v31  ;;  %v718_v49 = vadd.f32 %v717_v32, %v1402_v40  ;;  %v810_v61 = vsub.f32 %v760_v54, %v802_v51  ;;  %v832_v15 = vmul.f32 %v1424_v3, %v802_v51 }
 0x271   : > { %v719_v33 = vpop.f32.mrf.mxu0  ;;  %v874_v32 = vadd.s32 16, %v1390_v25 }
 0x272   : > { %v720_v34 = vadd.f32 %v719_v33, %v1396_v28  ;;  %v803_v57 = vmul.f32 2.0, %v718_v49  ;;  %v818_v8 = vmul.f32 %v810_v61, %v760_v54  ;;  %v764_v49 = vld [vmem:[%s1410_s30 + $0x20] sm:$0xff] }
 0x273   : > { %v723_v35 = vpop.f32.mrf.mxu0 }
 0x274   : > { %1183 = vtanh.f32 %v720_v34  ;;  %v724_v58 = vadd.f32 %v723_v35, %v1402_v40  ;;  %v811_v4 = vsub.f32 %v761_v62, %v803_v57  ;;  %v840_v21 = vadd.f32 %v832_v15, %v818_v8 }
 0x275   : > { %v725_v37 = vpop.f32.mrf.mxu0  ;;  %v833_v26 = vmul.f32 %v1424_v3, %v803_v57 }
 0x276   : > { %v726_v38 = vadd.f32 %v725_v37, %v1396_v28  ;;  %v804_v5 = vmul.f32 2.0, %v724_v58  ;;  %v819_v18 = vmul.f32 %v811_v4, %v761_v62  ;;  %v854_v36 = vsub.f32 %v840_v21, %v1440_v24 }
 0x277   : > { %v727_v39 = vpop.f32.mrf.mxu0 }
 0x278   : > { %1185 = vtanh.f32 %v726_v38  ;;  %v728_v12 = vadd.f32 %v727_v39, %v1402_v40  ;;  %v812_v19 = vsub.f32 %v762_v10, %v804_v5  ;;  %v841_v33 = vadd.f32 %v833_v26, %v819_v18 }
 0x279   : > { %v729_v41 = vpop.f32.mrf.mxu0  ;;  %v876_v18 = vadd.s32 32, %v1390_v25 }
 0x27a   : > { %v730_v42 = vadd.f32 %v729_v41, %v1396_v28  ;;  %v805_v22 = vmul.f32 2.0, %v728_v12  ;;  %v820_v34 = vmul.f32 %v812_v19, %v762_v10  ;;  %v882_v41 = vadd.s32 %v1429_v9, %v873_v27  ;;  %v766_v19 = vld [vmem:[%s1410_s30 + $0x30] sm:$0xff] }
 0x27b   : > { %v733_v43 = vpop.f32.mrf.mxu0 }
 0x27c   : > { %1187 = vtanh.f32 %v730_v42  ;;  %v734_v30 = vadd.f32 %v733_v43, %v1402_v40  ;;  %v813_v38 = vsub.f32 %v763_v29, %v805_v22  ;;  %v834_v42 = vmul.f32 %v1424_v3, %v804_v5 }
 0x27d   : > { %v1182_v45 = vpop.eup %1181  ;;  %v735_v46 = vpop.f32.mrf.mxu0  ;;  %vm890_vm2 = vcmp.lt.s32.totalorder %v882_v41, 100 }
 0x27e   : > { %v770_v47 = vsub.f32 0.0, %v1182_v45  ;;  %v736_v48 = vadd.f32 %v735_v46, %v1396_v28  ;;  %v806_v43 = vmul.f32 2.0, %v734_v30 }
 0x27f   : > { %v737_v50 = vpop.f32.mrf.mxu0 }
 0x280   : > { %v778_v52 = vmul.f32 1.442695, %v770_v47  ;;  %1189 = vtanh.f32 %v736_v48  ;;  %v738_v39 = vadd.f32 %v737_v50, %v1402_v40  ;;  %v883_v47 = vadd.s32 %v1429_v9, %v874_v32 }
 0x281   : > { %v1184_v53 = vpop.eup %1183  ;;  %v739_v55 = vpop.f32.mrf.mxu0  ;;  %v875_v48 = vadd.s32 24, %v1390_v25  ;;  %v814_v58 = vsub.f32 %v764_v49, %v806_v43  ;;  %v836_v21 = vmul.f32 %v1424_v3, %v806_v43 }
 0x282   : > { %1191 = vpow2.f32 %v778_v52  ;;  %v771_v56 = vsub.f32 0.0, %v1184_v53  ;;  %v740_v59 = vadd.f32 %v739_v55, %v1396_v28  ;;  %v855_v52 = vsub.f32 %v841_v33, %v1440_v24 }
 0x283   : > { %v1417_v60 = vpop.f32.mrf.mxu0  ;;  %v842_v53 = vadd.f32 %v834_v42, %v820_v34  ;;  %v807_v57 = vmul.f32 2.0, %v738_v39  ;;  %vm891_vm3 = vcmp.lt.s32.totalorder %v883_v47, 100  ;;  %v884_v5 = vadd.s32 %v1429_v9, %v875_v48 }
 0x284   : > { %v780_v63 = vmul.f32 1.442695, %v771_v56  ;;  %1193 = vtanh.f32 %v740_v59  ;;  %v821_v56 = vmul.f32 %v813_v38, %v763_v29  ;;  %v765_v59 = vld [vmem:[%s1410_s30 + $0x28] sm:$0xff]  ;;  %v744_v62 = vadd.f32 %v1417_v60, %v1402_v40 }
 0x285   : > { %v1186_v0 = vpop.eup %1185  ;;  %v745_v1 = vpop.f32.mrf.mxu0  ;;  %v856_v4 = vsub.f32 %v842_v53, %v1440_v24  ;;  %v815_v12 = vsub.f32 %v765_v59, %v807_v57  ;;  %vm892_vm4 = vcmp.lt.s32.totalorder %v884_v5, 100  ;;  %v837_v33 = vmul.f32 %v1424_v3, %v807_v57 }
 0x286   : > { %1195 = vpow2.f32 %v780_v63  ;;  %v772_v2 = vsub.f32 0.0, %v1186_v0  ;;  %v746_v6 = vadd.f32 %v745_v1, %v1396_v28  ;;  %v835_v1 = vmul.f32 %v1424_v3, %v805_v22 }
 0x287   : > { %v1427_v7 = vpop.f32.mrf.mxu0  ;;  %v808_v60 = vmul.f32 2.0, %v744_v62  ;;  %v823_v29 = vmul.f32 %v815_v12, %v765_v59  ;;  %v877_v34 = vadd.s32 40, %v1390_v25 }
 0x288   : > { %v782_v11 = vmul.f32 1.442695, %v772_v2  ;;  %1197 = vtanh.f32 %v746_v6  ;;  %v748_v15 = vadd.f32 %v1427_v7, %v1402_v40 }
 0x289   : > { %v1188_v13 = vpop.eup %1187  ;;  %v749_v14 = vpop.f32.mrf.mxu0  ;;  %v816_v40 = vsub.f32 %v766_v19, %v808_v60  ;;  %v845_v38 = vadd.f32 %v837_v33, %v823_v29  ;;  %v838_v47 = vmul.f32 %v1424_v3, %v808_v60 }
 0x28a   : > { %1199 = vpow2.f32 %v782_v11  ;;  %v773_v16 = vsub.f32 0.0, %v1188_v13  ;;  %v750_v20 = vadd.f32 %v749_v14, %v1396_v28  ;;  %v843_v11 = vadd.f32 %v835_v1, %v821_v56 }
 0x28b   : > { %v822_v13 = vmul.f32 %v814_v58, %v764_v49  ;;  %v809_v7 = vmul.f32 2.0, %v748_v15  ;;  %v824_v42 = vmul.f32 %v816_v40, %v766_v19  ;;  %v859_v49 = vsub.f32 %v845_v38, %v1440_v24 }
 0x28c   : > { %v784_v23 = vmul.f32 1.442695, %v773_v16  ;;  %1201 = vtanh.f32 %v750_v20  ;;  %v857_v26 = vsub.f32 %v843_v11, %v1440_v24  ;;  %v879_v56 = vadd.s32 56, %v1390_v25 }
 0x28d   : > { %v1190_v31 = vpop.eup %1189  ;;  %v844_v30 = vadd.f32 %v836_v21, %v822_v13  ;;  %v846_v53 = vadd.f32 %v838_v47, %v824_v42  ;;  %v839_v58 = vmul.f32 %v1424_v3, %v809_v7 }
 0x28e   : > { %1203 = vpow2.f32 %v784_v23  ;;  %v774_v35 = vsub.f32 0.0, %v1190_v31  ;;  %v888_v1 = vadd.s32 %v1429_v9, %v879_v56 }
 0x28f   : > { %v1192_v28 = vpop.eup %1191  ;;  %v858_v39 = vsub.f32 %v844_v30, %v1440_v24  ;;  %v860_v62 = vsub.f32 %v846_v53, %v1440_v24 }
 0x290   : > { %v794_v37 = vmul.f32 -0.5, %v1192_v28  ;;  %v786_v44 = vmul.f32 1.442695, %v774_v35  ;;  %v885_v28 = vadd.s32 %v1429_v9, %v876_v18  ;;  %v767_v35 = vld [vmem:[%s1410_s30 + $0x38] sm:$0xff]  ;;  %vm896_vm8 = vcmp.lt.s32.totalorder %v888_v1, 100 }
 0x291   : > { %v1194_v45 = vpop.eup %1193  ;;  %v817_v43 = vsub.f32 %v767_v35, %v809_v7 }
 0x292   : > { %v862_v46 = vmul.f32 %v854_v36, %v794_v37  ;;  %1205 = vpow2.f32 %v786_v44  ;;  %v775_v50 = vsub.f32 0.0, %v1194_v45  ;;  %vm893_vm5 = vcmp.lt.s32.totalorder %v885_v28, 100 }
 0x293   : > { %v1196_v51 = vpop.eup %1195  ;;  %v886_v44 = vadd.s32 %v1429_v9, %v877_v34  ;;  %v878_v45 = vadd.s32 48, %v1390_v25 }
 0x294   : > { %v1456_v54 = vsel %vm889_vm1, %v862_v46, 0.0  ;;  %v795_v55 = vmul.f32 -0.5, %v1196_v51  ;;  %v788_v61 = vmul.f32 1.442695, %v775_v50  ;;  %v825_v50 = vmul.f32 %v817_v43, %v767_v35 }
 0x295   : > { %v1198_v63 = vpop.eup %1197  ;;  %vm894_vm6 = vcmp.lt.s32.totalorder %v886_v44, 100 }
 0x296   : > { %v863_v0 = vmul.f32 %v855_v52, %v795_v55  ;;  %1207 = vpow2.f32 %v788_v61  ;;  %v776_v6 = vsub.f32 0.0, %v1198_v63  ;;  %v887_v55 = vadd.s32 %v1429_v9, %v878_v45 }
 0x297   : > { %v1200_v2 = vpop.eup %1199 }
 0x298   : > { %v1464_v8 = vsel %vm890_vm2, %v863_v0, 0.0  ;;  %v796_v10 = vmul.f32 -0.5, %v1200_v2  ;;  %v790_v14 = vmul.f32 1.442695, %v776_v6  ;;  %v847_v0 = vadd.f32 %v839_v58, %v825_v50 }
 0x299   : > { %v1202_v16 = vpop.eup %1201  ;;  %vm895_vm7 = vcmp.lt.s32.totalorder %v887_v55, 100 }
 0x29a   : > { %v864_v17 = vmul.f32 %v856_v4, %v796_v10  ;;  %1209 = vpow2.f32 %v790_v14  ;;  %v777_v22 = vsub.f32 0.0, %v1202_v16  ;;  %v861_v6 = vsub.f32 %v847_v0, %v1440_v24 }
 0x29b   : > { %v1204_v20 = vpop.eup %1203 }
 0x29c   : > { %v915_v23 = vsel %vm891_vm3, %v864_v17, 0.0  ;;  %v797_v27 = vmul.f32 -0.5, %v1204_v20  ;;  %v792_v31 = vmul.f32 1.442695, %v777_v22 }
 0x29e   : > { %v865_v32 = vmul.f32 %v857_v26, %v797_v27  ;;  %1211 = vpow2.f32 %v792_v31 }
 0x29f   : > { %v1206_v36 = vpop.eup %1205 }
 0x2a0   : > { %v916_v37 = vsel %vm892_vm4, %v865_v32, 0.0  ;;  %v798_v41 = vmul.f32 -0.5, %v1206_v36 }
 0x2a2   : > { %v866_v46 = vmul.f32 %v858_v39, %v798_v41 }
 0x2a3   : > { %v1208_v48 = vpop.eup %1207 }
 0x2a4   : > { %v917_v51 = vsel %vm893_vm5, %v866_v46, 0.0  ;;  %v799_v52 = vmul.f32 -0.5, %v1208_v48 }
 0x2a6   : > { %v867_v57 = vmul.f32 %v859_v49, %v799_v52 }
 0x2a7   : > { %v1210_v59 = vpop.eup %1209 }
 0x2a8   : > { %v918_v61 = vsel %vm894_vm6, %v867_v57, 0.0  ;;  %v800_v63 = vmul.f32 -0.5, %v1210_v59 }
 0x2aa   : > { %v868_v2 = vmul.f32 %v860_v62, %v800_v63 }
 0x2ab   : > { %v1212_v4 = vpop.eup %1211 }
 0x2ac   : > { %v919_v5 = vsel %vm895_vm7, %v868_v2, 0.0  ;;  %v801_v10 = vmul.f32 -0.5, %v1212_v4  ;;  %924 = sbr.rel (%p1068_p4) target bundleno = 691 (0x2b3), region = 52 }
 0x2ae   : > { %v869_v25 = vmul.f32 %v861_v6, %v801_v10 }
 0x2b0   : > { %v920_v11 = vsel %vm896_vm8, %v869_v25, 0.0 }
 0x2b1   : > { %vm925_vm9 = vcmask 0   ;;  %v1250_v3 = vmov 0.0  }
 0x2b2   : > { %926 = vst.msk [vmem:[#allocation2] sm:$0x1] %vm925_vm9, %v1250_v3 }
 0x2b3 PF: > { %vm928_vm10 = vcmask 64512   ;;  %vm955_vm11 = vcmask 0   ;;  %p1069_p5 = scmp.ne.s32.totalorder %s1298_s25, 1 }
 0x2b4   : > { %v929_v12 = vsel %vm928_vm10, %v1456_v54, 0.0  ;;  %v930_v9 = vsel %vm928_vm10, %v1464_v8, 0.0  ;;  %v932_v13 = vsel %vm928_vm10, %v915_v23, 0.0  ;;  %v934_v14 = vsel %vm928_vm10, %v916_v37, 0.0 }
 0x2b5   : > { %v931_v60 = vadd.f32 %v930_v9, %v929_v12  ;;  %v936_v15 = vsel %vm928_vm10, %v917_v51, 0.0  ;;  %v938_v17 = vsel %vm928_vm10, %v918_v61, 0.0  ;;  %v940_v19 = vsel %vm928_vm10, %v919_v5, 0.0 }
 0x2b6   : > { %v942_v21 = vsel %vm928_vm10, %v920_v11, 0.0 }
 0x2b7   : > { %v933_v24 = vadd.f32 %v932_v13, %v931_v60 }
 0x2b9   : > { %v935_v16 = vadd.f32 %v934_v14, %v933_v24  ;;  %v927_v7 = vld [vmem:[#allocation2] sm:$0x1] }
 0x2bb   : > { %v937_v18 = vadd.f32 %v936_v15, %v935_v16 }
 0x2bd   : > { %v939_v20 = vadd.f32 %v938_v17, %v937_v18 }
 0x2bf   : > { %v941_v22 = vadd.f32 %v940_v19, %v939_v20 }
 0x2c1   : > { %v943_v26 = vadd.f32 %v942_v21, %v941_v22 }
 0x2c3   : > { %944 = vadd.xlane.f32.xlu0 %v943_v26 }
 0x34c   : > { %v945_v27 = vpop.xlane.xlu0 %944 }
 0x34d   : > { %v946_v29 = vrot.slane %v945_v27, 4 }
 0x34f   : > { %v947_v30 = vadd.f32 %v946_v29, %v945_v27 }
 0x351   : > { %v948_v54 = vrot.slane %v947_v30, 2 }
 0x353   : > { %v949_v40 = vadd.f32 %v948_v54, %v947_v30 }
 0x355   : > { %v950_v8 = vrot.slane %v949_v40, 1 }
 0x357   : > { %v951_v23 = vadd.f32 %v950_v8, %v949_v40 }
 0x359   : > { %1125 = vpush %v951_v23 }
 0x38a   : > { %s1126_s12 = spop %1125  ;;  %960 = sbr.rel (%p1069_p5) target bundleno = 921 (0x399), region = 56 }
 0x38b   : > { %v953_v31 = vstv %s1126_s12 }
 0x38c   : > { %v954_v32 = vadd.f32 %v953_v31, %v927_v7 }
 0x38e   : > { %956 = vst.msk [vmem:[#allocation2] sm:$0x1] %vm955_vm11, %v954_v32 }
 0x395   : > { %v961_v28 = vld [vmem:[#allocation2] sm:$0x1] }
 0x396   : > { %v962_v33 = vmul.f32 0.01, %v961_v28 }
 0x398   : > { %963 = vst.msk [vmem:[#allocation2] sm:$0x1] %vm955_vm11, %v962_v33 }
 0x399 PF: > { %p1131_p6 = scmp.eq.s32.totalorder %s1298_s25, 1  ;;  %s1251_s13 = smov [#allocation2]  }
 0x39a   : > { %s971_s14 = sshll.u32 %s1251_s13, 4  ;;  %s972_s14 = int_to_ptr.vmem [resolvable:$true] %s971_s14 }
 0x39b   : > { %s1213_s15 = scalar_lea.vmem %s972_s14, 16  ;;  %s1219_s16 = scalar_lea.vmem %s972_s14, 32 }
 0x39c   : > { %p1214_p7 = scmp.ne.s32.totalorder %s972_s14, %s1213_s15  ;;  %p1220_p10 = scmp.lt.s32.totalorder %s972_s14, %s972_s14 }
 0x39d   : > { %p1221_p11 = scmp.lt.s32.totalorder %s1219_s16, %s1213_s15 }
 0x39e   : > { %p1215_p8 = pnand %p1214_p7, %p1131_p6 }
 0x39f   : > { %p1222_p12 = por %p1221_p11, %p1220_p10 }
 0x3a0   : > { %p1216_p9 = pneg %p1215_p8 }
 0x3a2   : > { %p1223_p13 = pnand %p1222_p12, %p1216_p9 }
 0x3a4   : > { %1226 = shalt.err (!%p1223_p13)
}
 0x3a5   : > { %1128 = dma.vmem_to_hbm [thread:$0]  (%p1131_p6), %s972_s14, 16, %s1515_s7, [#allocation3]  }
 0x3a6   : > { %1242 = dma.done.wait (%p1131_p6), [#allocation3], 16  }
 0x3a7   : > { %1244 = vsyncadd (%p1131_p6), [#allocation3], 4294967280 }
 0x3a8 PF: > { %s18_s24 = sadd.s32 1, %s1247_s24  }
 0x3a9   : > { %p15_p0 = scmp.ge.s32.totalorder %s18_s24, 4  }
 0x3ab   :  { %17 = sbr.rel (!%p15_p0) target bundleno = 1 (0x1), region = 86 }
 0x3b0   :  { %984 = vsyncpa [#allocation3], 1 }
 0x3b1   :  { %986 = vsyncpa [#allocation3 + $0x1], 1 }

</bundles_post_ra>
